<compile_context>
chip_gen: v6e
topology: v6e:2x2x1
jax: 0.10.0
libtpu: 0.0.40
codegen_flags: <defaults>
</compile_context>

<pallas_src>
import functools

import jax
import jax.numpy as jnp
from jax.experimental import pallas as pl
from jax.experimental.pallas import tpu as pltpu

LANES = 128
MAX_BLOCK_BYTES = 8 * 1024 * 1024  # per-input, per-buffer block target (~8 MiB)


def _round_up(a, b):
    return -(-a // b) * b


def _vmem_capacity_bytes():
    """Per-core VMEM capacity; conservative 64 MiB (v7x) fallback."""
    try:
        info = pltpu.get_tpu_info()
        cap = int(getattr(info, "vmem_capacity_bytes", 0) or 0)
        if cap > 0:
            return cap
    except Exception:
        pass
    return 64 * 1024 * 1024


def _num_tensorcores():
    """TensorCores per chip for the megacore split; falls back to 1."""
    try:
        info = pltpu.get_tpu_info()
        for attr in ("num_cores", "tensorcore_count", "num_tensorcores", "core_count"):
            n = getattr(info, attr, None)
            if isinstance(n, int) and n > 0:
                return max(1, min(2, n))
    except Exception:
        pass
    return 1


def _charbonnier_kernel(x_ref, y_ref, o_ref, *, eps_sq, n_valid, block_elems,
                        tiles_per_core):
    c = pl.program_id(0)          # core (parallel axis)
    i = pl.program_id(1)          # tile within this core (reduction axis)

    @pl.when(i == 0)
    def _init():
        o_ref[...] = jnp.zeros_like(o_ref)

    x = x_ref[...].astype(jnp.float32)
    y = y_ref[...].astype(jnp.float32)
    d = x - y
    val = jnp.sqrt(d * d + jnp.float32(eps_sq))

    # Global flat offset of this block (int32; wrapper asserts no overflow).
    block_start = (c * tiles_per_core + i) * block_elems
    full = block_start + block_elems <= n_valid

    # Hot path: fully-valid block.  Pure element-wise VPU work; reduce the tile
    # to one (8, 128) vreg (cross-vreg adds) and accumulate into the resident
    # output block.  No masks, no XLU reduce, no tile-sized stores.
    @pl.when(full)
    def _accumulate():
        o_ref[...] += val.reshape(-1, 8, LANES).sum(axis=0, keepdims=True)

    # Tail path: block contains wrapper zero-padding (or is entirely padding
    # on an idle core).  Exclude padded slots with a select, then reduce.
    @pl.when(jnp.logical_not(full))
    def _tail():
        rid = jax.lax.broadcasted_iota(jnp.int32, val.shape, 0)
        cid = jax.lax.broadcasted_iota(jnp.int32, val.shape, 1)
        local_idx = rid * LANES + cid
        valid = n_valid - block_start          # may be <= 0 (all padding)
        masked = jnp.where(local_idx < valid, val, 0.0)
        o_ref[...] += masked.reshape(-1, 8, LANES).sum(axis=0, keepdims=True)


def charbonnier_loss(x, y, eps=1e-3):
    """mean(sqrt((x - y)^2 + eps^2)) over all elements, computed in Pallas."""
    assert x.shape == y.shape, (x.shape, y.shape)
    n_valid = int(x.size)
    assert n_valid > 0
    assert n_valid < 2**31, "int32 index arithmetic in-kernel"

    isx = jnp.dtype(x.dtype).itemsize
    isy = jnp.dtype(y.dtype).itemsize
    # Sublane granularity from the most tightly packed dtype; keeping
    # tile_rows a multiple of `sub` keeps (8,128) divisibility for both inputs.
    sub = {4: 8, 2: 16, 1: 32}.get(min(isx, isy), 8)

    # Logical rows of the lane-dense slab, rounded up to sublane granularity.
    rows = _round_up(-(-n_valid // LANES), sub)

    nc = _num_tensorcores()

    # --- tile size: as big as the VMEM budget / ~8 MiB target allows ---------
    vmem_cap = _vmem_capacity_bytes()
    # Keep the double-buffered input pipeline within ~half of VMEM (headroom
    # for compiler scratch, the resident output vreg, and v7x's 64 MiB/TC).
    pipeline_budget = max(4 << 20, vmem_cap // 2)
    rows_budget = pipeline_budget // (2 * LANES * (isx + isy))
    rows_target = MAX_BLOCK_BYTES // (LANES * max(isx, isy))
    rows_per_core = _round_up(-(-rows // nc), sub)
    tile_rows = min(rows_budget, rows_target, rows_per_core)
    tile_rows = max(sub, (tile_rows // sub) * sub)

    num_blocks = -(-rows // tile_rows)
    tiles_per_core = -(-num_blocks // nc)
    total_blocks = nc * tiles_per_core
    padded_rows = total_blocks * tile_rows
    padded_elems = padded_rows * LANES
    assert padded_elems < 2**31

    # --- flatten + zero-pad to a whole number of blocks ----------------------
    xf = jnp.ravel(x)
    yf = jnp.ravel(y)
    pad = padded_elems - n_valid
    if pad:
        xf = jnp.pad(xf, (0, pad))
        yf = jnp.pad(yf, (0, pad))
    x2d = xf.reshape(padded_rows, LANES)
    y2d = yf.reshape(padded_rows, LANES)

    block_elems = tile_rows * LANES
    kernel = functools.partial(
        _charbonnier_kernel,
        eps_sq=float(eps) * float(eps),
        n_valid=n_valid,
        block_elems=block_elems,
        tiles_per_core=tiles_per_core,
    )

    in_map = lambda c, i: (c * tiles_per_core + i, 0)

    vmem_needed = 2 * tile_rows * LANES * (isx + isy) + 2 * (8 * LANES * 4)
    vmem_limit = int(min(vmem_cap, max(16 << 20, vmem_needed + (8 << 20))))

    partials = pl.pallas_call(
        kernel,
        out_shape=jax.ShapeDtypeStruct((nc, 8, LANES), jnp.float32),
        grid_spec=pltpu.PrefetchScalarGridSpec(
            num_scalar_prefetch=0,
            grid=(nc, tiles_per_core),
            in_specs=[
                pl.BlockSpec((tile_rows, LANES), in_map),
                pl.BlockSpec((tile_rows, LANES), in_map),
            ],
            out_specs=pl.BlockSpec((1, 8, LANES), lambda c, i: (c, 0, 0)),
        ),
        compiler_params=pltpu.CompilerParams(
            dimension_semantics=("parallel", "arbitrary"),
            vmem_limit_bytes=vmem_limit,
        ),
    )(x2d, y2d)

    loss = jnp.sum(partials) / jnp.float32(n_valid)
    return loss.astype(x.dtype)


if __name__ == "__main__":
    key = jax.random.PRNGKey(0)
    kx, ky = jax.random.split(key)

    def ref_loss(a, b, eps=1e-3):
        d = a.astype(jnp.float32) - b.astype(jnp.float32)
        return jnp.mean(jnp.sqrt(d * d + eps * eps))

    # 1) Small NCHW input, exactly lane/sublane aligned (2*4*16*16 = 2048).
    x = jax.random.normal(kx, (2, 4, 16, 16), dtype=jnp.float32)
    y = jax.random.normal(ky, (2, 4, 16, 16), dtype=jnp.float32)
    loss = charbonnier_loss(x, y, eps=1e-3)
    jax.block_until_ready(loss)
    assert jnp.allclose(loss, ref_loss(x, y), rtol=1e-5, atol=1e-6), (
        loss, ref_loss(x, y))

    # 2) Unaligned element count (2*3*17*19 = 1938) -> zero-pad + tail mask.
    x2 = jax.random.normal(kx, (2, 3, 17, 19), dtype=jnp.float32)
    y2 = jax.random.normal(ky, (2, 3, 17, 19), dtype=jnp.float32)
    loss2 = charbonnier_loss(x2, y2, eps=1e-3)
    jax.block_until_ready(loss2)
    assert jnp.allclose(loss2, ref_loss(x2, y2), rtol=1e-5, atol=1e-6), (
        loss2, ref_loss(x2, y2))

    # 3) Larger case (2*4*256*256 = 524288) -> multi-vreg per-step reduction
    #    into the (8,128) partial accumulator.
    x3 = jax.random.normal(kx, (2, 4, 256, 256), dtype=jnp.float32)
    y3 = jax.random.normal(ky, (2, 4, 256, 256), dtype=jnp.float32)
    loss3 = charbonnier_loss(x3, y3, eps=1e-3)
    jax.block_until_ready(loss3)
    assert jnp.allclose(loss3, ref_loss(x3, y3), rtol=1e-4, atol=1e-6), (
        loss3, ref_loss(x3, y3))

    # 4) bf16 inputs stream in native dtype; accumulation stays float32.
    xb = jax.random.normal(kx, (2, 4, 32, 32), dtype=jnp.bfloat16)
    yb = jax.random.normal(ky, (2, 4, 32, 32), dtype=jnp.bfloat16)
    lossb = charbonnier_loss(xb, yb, eps=1e-3)
    jax.block_until_ready(lossb)
    assert jnp.allclose(lossb.astype(jnp.float32), ref_loss(xb, yb),
                        rtol=2e-2, atol=1e-3), (lossb, ref_loss(xb, yb))

    print("KERNEL_OK")
</pallas_src>

<mosaic_0001>
module attributes {stable_mosaic.version = 11 : i64} {
  func.func @_charbonnier_kernel(%arg0: i32, %arg1: i32, %arg2: memref<16x128xf32, #tpu.memory_space<vmem>>, %arg3: memref<16x128xf32, #tpu.memory_space<vmem>>, %arg4: memref<1x8x128xf32, #tpu.memory_space<vmem>>) attributes {dimension_semantics = [#tpu.dimension_semantics<parallel>, #tpu.dimension_semantics<arbitrary>], iteration_bounds = array<i64: 1, 1>, scalar_prefetch = 0 : i64, scratch_operands = 0 : i64, tpu.core_type = #tpu.core_type<tc>, window_params = [{transform_indices = @transform_0, window_bounds = array<i64: 16, 128>}, {transform_indices = @transform_1, window_bounds = array<i64: 16, 128>}, {transform_indices = @transform_2, window_bounds = array<i64: 1, 8, 128>}]} {
    %c0_i32 = arith.constant 0 : i32
    %0 = arith.cmpi eq, %arg1, %c0_i32 : i32
    %1 = arith.extui %0 : i1 to i32
    %c0_i32_0 = arith.constant 0 : i32
    %2 = arith.cmpi ne, %1, %c0_i32_0 : i32
    scf.if %2 {
      %cst_8 = arith.constant 0.000000e+00 : f32
      %20 = vector.broadcast %cst_8 : f32 to vector<1x8x128xf32>
      %c0_9 = arith.constant 0 : index
      %c0_10 = arith.constant 0 : index
      %c0_11 = arith.constant 0 : index
      %21 = vector.load %arg4[%c0_9, %c0_10, %c0_11] : memref<1x8x128xf32, #tpu.memory_space<vmem>>, vector<1x8x128xf32>
      tpu.vector_store %arg4[%c0_9, %c0_10, %c0_11], %20 {strides = array<i32>} : memref<1x8x128xf32, #tpu.memory_space<vmem>>, vector<1x8x128xf32>,
    } else {
    }
    %c0 = arith.constant 0 : index
    %c0_1 = arith.constant 0 : index
    %3 = vector.load %arg2[%c0, %c0_1] : memref<16x128xf32, #tpu.memory_space<vmem>>, vector<16x128xf32>
    %c0_2 = arith.constant 0 : index
    %c0_3 = arith.constant 0 : index
    %4 = vector.load %arg3[%c0_2, %c0_3] : memref<16x128xf32, #tpu.memory_space<vmem>>, vector<16x128xf32>
    %5 = arith.subf %3, %4 : vector<16x128xf32>
    %6 = arith.mulf %5, %5 : vector<16x128xf32>
    %cst = arith.constant 9.99999997E-7 : f32
    %7 = vector.broadcast %cst : f32 to vector<16x128xf32>
    %8 = arith.addf %6, %7 : vector<16x128xf32>
    %9 = math.sqrt %8 : vector<16x128xf32>
    %c1_i32 = arith.constant 1 : i32
    %10 = arith.muli %arg0, %c1_i32 : i32
    %11 = arith.addi %10, %arg1 : i32
    %c2048_i32 = arith.constant 2048 : i32
    %12 = arith.muli %11, %c2048_i32 : i32
    %c2048_i32_4 = arith.constant 2048 : i32
    %13 = arith.addi %12, %c2048_i32_4 : i32
    %c2048_i32_5 = arith.constant 2048 : i32
    %14 = arith.cmpi sle, %13, %c2048_i32_5 : i32
    %15 = arith.extui %14 : i1 to i32
    %c0_i32_6 = arith.constant 0 : i32
    %16 = arith.cmpi ne, %15, %c0_i32_6 : i32
    scf.if %16 {
      %c0_8 = arith.constant 0 : index
      %c0_9 = arith.constant 0 : index
      %c0_10 = arith.constant 0 : index
      %20 = vector.load %arg4[%c0_8, %c0_9, %c0_10] : memref<1x8x128xf32, #tpu.memory_space<vmem>>, vector<1x8x128xf32>
      %21 = vector.shape_cast %9 : vector<16x128xf32> to vector<2x8x128xf32>
      %cst_11 = arith.constant dense<0.000000e+00> : vector<8x128xf32>
      %22 = vector.multi_reduction <add>, %21, %cst_11 [0] : vector<2x8x128xf32> to vector<8x128xf32>
      %23 = vector.shape_cast %22 : vector<8x128xf32> to vector<1x8x128xf32>
      %24 = arith.addf %20, %23 : vector<1x8x128xf32>
      %c0_12 = arith.constant 0 : index
      %c0_13 = arith.constant 0 : index
      %c0_14 = arith.constant 0 : index
      %25 = vector.load %arg4[%c0_12, %c0_13, %c0_14] : memref<1x8x128xf32, #tpu.memory_space<vmem>>, vector<1x8x128xf32>
      tpu.vector_store %arg4[%c0_12, %c0_13, %c0_14], %24 {strides = array<i32>} : memref<1x8x128xf32, #tpu.memory_space<vmem>>, vector<1x8x128xf32>,
    } else {
    }
    %true = arith.constant true
    %17 = arith.xori %14, %true : i1
    %18 = arith.extui %17 : i1 to i32
    %c0_i32_7 = arith.constant 0 : i32
    %19 = arith.cmpi ne, %18, %c0_i32_7 : i32
    scf.if %19 {
      %20 = tpu.iota {dimensions = array<i32: 0>} : vector<16x128xi32>
      %21 = tpu.iota {dimensions = array<i32: 1>} : vector<16x128xi32>
      %c128_i32 = arith.constant 128 : i32
      %22 = vector.broadcast %c128_i32 : i32 to vector<16x128xi32>
      %23 = arith.muli %20, %22 : vector<16x128xi32>
      %24 = arith.addi %23, %21 : vector<16x128xi32>
      %c2048_i32_8 = arith.constant 2048 : i32
      %25 = arith.subi %c2048_i32_8, %12 : i32
      %26 = vector.broadcast %25 : i32 to vector<16x128xi32>
      %27 = arith.cmpi slt, %24, %26 : vector<16x128xi32>
      %cst_9 = arith.constant 0.000000e+00 : f32
      %28 = vector.broadcast %cst_9 : f32 to vector<16x128xf32>
      %29 = arith.select %27, %9, %28 : vector<16x128xi1>, vector<16x128xf32>
      %c0_10 = arith.constant 0 : index
      %c0_11 = arith.constant 0 : index
      %c0_12 = arith.constant 0 : index
      %30 = vector.load %arg4[%c0_10, %c0_11, %c0_12] : memref<1x8x128xf32, #tpu.memory_space<vmem>>, vector<1x8x128xf32>
      %31 = vector.shape_cast %29 : vector<16x128xf32> to vector<2x8x128xf32>
      %cst_13 = arith.constant dense<0.000000e+00> : vector<8x128xf32>
      %32 = vector.multi_reduction <add>, %31, %cst_13 [0] : vector<2x8x128xf32> to vector<8x128xf32>
      %33 = vector.shape_cast %32 : vector<8x128xf32> to vector<1x8x128xf32>
      %34 = arith.addf %30, %33 : vector<1x8x128xf32>
      %c0_14 = arith.constant 0 : index
      %c0_15 = arith.constant 0 : index
      %c0_16 = arith.constant 0 : index
      %35 = vector.load %arg4[%c0_14, %c0_15, %c0_16] : memref<1x8x128xf32, #tpu.memory_space<vmem>>, vector<1x8x128xf32>
      tpu.vector_store %arg4[%c0_14, %c0_15, %c0_16], %34 {strides = array<i32>} : memref<1x8x128xf32, #tpu.memory_space<vmem>>, vector<1x8x128xf32>,
    } else {
    }
    return
  }
  func.func @transform_0(%arg0: i32, %arg1: i32) -> (i32, i32) {
    %c1_i32 = arith.constant 1 : i32
    %0 = arith.muli %arg0, %c1_i32 : i32
    %1 = arith.addi %0, %arg1 : i32
    %c0_i32 = arith.constant 0 : i32
    %c0_i32_0 = arith.constant 0 : i32
    return %1, %c0_i32 : i32, i32
  }
  func.func @transform_1(%arg0: i32, %arg1: i32) -> (i32, i32) {
    %c1_i32 = arith.constant 1 : i32
    %0 = arith.muli %arg0, %c1_i32 : i32
    %1 = arith.addi %0, %arg1 : i32
    %c0_i32 = arith.constant 0 : i32
    %c0_i32_0 = arith.constant 0 : i32
    return %1, %c0_i32 : i32, i32
  }
  func.func @transform_2(%arg0: i32, %arg1: i32) -> (i32, i32, i32) {
    %c0_i32 = arith.constant 0 : i32
    %c0_i32_0 = arith.constant 0 : i32
    %c0_i32_1 = arith.constant 0 : i32
    return %arg0, %c0_i32, %c0_i32_0 : i32, i32, i32
  }
}

</mosaic_0001>

<bundles_post_ra>
// kernel: tpu_custom_call.1
= control target key start
LH: loop header
LB: loop body
LE: loop exit
PB: predicated region body
PF: predicated region fallthrough
CT: control target
= control target key end

     0   :  { %7 = vsyncpa [#allocation3], 0  ;;  %s236_s0 = inlined_call_operand.hbm [shape: f32[16,128], index: 0, kind: input, shape index: {}]   ;;  %s237_s1 = inlined_call_operand.hbm [shape: f32[16,128], index: 1, kind: input, shape index: {}]   ;;  %s238_s2 = inlined_call_operand.hbm [shape: f32[1,8,128], index: 2, kind: output, shape index: {}]  }
   0x1   :  { %8 = vsyncpa [#allocation6], 0 }
   0x2   :  { %9 = vsyncpa [#allocation4], 0  ;;  %s207_s9 = smov [#allocation2]  }
   0x3   :  { %s19_s10 = sshll.u32 %s207_s9, 4  ;;  %s20_s10 = int_to_ptr.vmem [resolvable:$true] %s19_s10 }
   0x4   :  { %s149_s11 = scalar_lea.vmem %s20_s10, 256  ;;  %p154_p1 = scmp.lt.s32.totalorder %s20_s10, %s20_s10 }
   0x5   :  { %p150_p0 = scmp.ne.s32.totalorder %s20_s10, %s149_s11  ;;  %p155_p2 = scmp.lt.s32.totalorder %s149_s11, %s149_s11 }
   0x7   :  { %p156_p3 = por %p155_p2, %p154_p1 }
   0x9   :  { %p157_p4 = pnand %p156_p3, %p150_p0 }
   0xb   :  { %160 = shalt.err (!%p157_p4)
}
   0xc   :  { %s208_s12 = smov 128   ;;  %s209_s13 = smov 8  }
   0xd   :  { %25 = dma.hbm_to_vmem [thread:$0]  %s236_s0, 256, %s20_s10, [#allocation3], %s208_s12, %s208_s12, %s209_s13  }
   0xe   :  { %s210_s16 = smov [#allocation5]  }
   0xf   :  { %s35_s17 = sshll.u32 %s210_s16, 4  ;;  %s36_s17 = int_to_ptr.vmem [resolvable:$true] %s35_s17 }
  0x10   :  { %s169_s18 = scalar_lea.vmem %s36_s17, 256  ;;  %p174_p6 = scmp.lt.s32.totalorder %s36_s17, %s36_s17 }
  0x11   :  { %p170_p5 = scmp.ne.s32.totalorder %s36_s17, %s169_s18  ;;  %p175_p7 = scmp.lt.s32.totalorder %s169_s18, %s169_s18 }
  0x13   :  { %p176_p8 = por %p175_p7, %p174_p6 }
  0x15   :  { %p177_p9 = pnand %p176_p8, %p170_p5 }
  0x17   :  { %180 = shalt.err (!%p177_p9)
}
  0x18   :  { %41 = dma.hbm_to_vmem [thread:$0]  %s237_s1, 256, %s36_s17, [#allocation6], %s208_s12, %s208_s12, %s209_s13  }
  0x19   :  { %201 = dma.done.wait [#allocation3], 256  }
  0x1a   :  { %202 = vsyncadd [#allocation3], 4294967040 }
  0x1b   :  { %203 = dma.done.wait [#allocation6], 256  }
  0x1c   :  { %204 = vsyncadd [#allocation6], 4294967040  ;;  %v57_v0 = vld [vmem:[#allocation2] sm:$0xff]  ;;  %v58_v1 = vld [vmem:[#allocation2 + $0x8] sm:$0xff]  ;;  %s211_s0 = smov [#allocation7]  }
  0x1d   :  { %v59_v2 = vld [vmem:[#allocation5] sm:$0xff]  ;;  %v60_v3 = vld [vmem:[#allocation5 + $0x8] sm:$0xff]  ;;  %s121_s1 = sshll.u32 %s211_s0, 4  ;;  %s122_s1 = int_to_ptr.vmem [resolvable:$true] %s121_s1 }
  0x1e   :  { %v61_v4 = vsub.f32 %v57_v0, %v59_v2  ;;  %v62_v5 = vsub.f32 %v58_v1, %v60_v3  ;;  %s181_s21 = scalar_lea.vmem %s122_s1, 128  ;;  %p186_p11 = scmp.lt.s32.totalorder %s122_s1, %s122_s1 }
  0x1f   :  { %p182_p10 = scmp.ne.s32.totalorder %s122_s1, %s181_s21  ;;  %p187_p12 = scmp.lt.s32.totalorder %s181_s21, %s181_s21 }
  0x20   :  { %v63_v6 = vmul.f32 %v61_v4, %v61_v4  ;;  %v64_v7 = vmul.f32 %v62_v5, %v62_v5 }
  0x21   :  { %p188_p13 = por %p187_p12, %p186_p11 }
  0x22   :  { %v65_v8 = vadd.f32 1e-06, %v63_v6  ;;  %v66_v9 = vadd.f32 1e-06, %v64_v7 }
  0x23   :  { %p189_p0 = pnand %p188_p13, %p182_p10 }
  0x24   :  { %137 = vrsqrt.f32 %v65_v8  ;;  %vm69_vm0 = vcmp.eq.f32.partialorder %v65_v8, inf  ;;  %v72_v11 = vand.u32 2147483648, %v65_v8  ;;  %vm71_vm1 = vcmp.eq.f32.partialorder %v65_v8, 0.0 }
  0x25   :  { %139 = vrsqrt.f32 %v66_v9  ;;  %vm76_vm2 = vcmp.eq.f32.partialorder %v66_v9, inf  ;;  %v79_v14 = vand.u32 2147483648, %v66_v9  ;;  %vm78_vm3 = vcmp.eq.f32.partialorder %v66_v9, 0.0 }
  0x31   :  { %v138_v10 = vpop.eup %137 }
  0x32   :  { %v140_v12 = vpop.eup %139  ;;  %v68_v13 = vmul.f32 %v138_v10, %v65_v8 }
  0x33   :  { %v75_v15 = vmul.f32 %v140_v12, %v66_v9 }
  0x34   :  { %v70_v16 = vsel %vm69_vm0, %v65_v8, %v68_v13 }
  0x35   :  { %v73_v17 = vsel %vm71_vm1, %v72_v11, %v70_v16  ;;  %v77_v18 = vsel %vm76_vm2, %v66_v9, %v75_v15 }
  0x36   :  { %v80_v19 = vsel %vm78_vm3, %v79_v14, %v77_v18 }
  0x37   :  { %v89_v20 = vadd.f32 %v80_v19, %v73_v17 }
  0x39   :  { %91 = vst [vmem:[#allocation7] sm:$0xff] %v89_v20 }
  0x3a   :  { %192 = shalt.err (!%p189_p0)
}
  0x3b   :  { %124 = dma.vmem_to_hbm [thread:$0]  %s122_s1, 128, %s238_s2, [#allocation4]  }
  0x3c   :  { %205 = dma.done.wait [#allocation4], 128  }
  0x3d   :  { %206 = vsyncadd [#allocation4], 4294967168 }
  0x3e   :  { %128 = vsyncpa [#allocation3], 1 }
  0x3f   :  { %129 = vsyncpa [#allocation6], 1 }
  0x40   :  { %130 = vsyncpa [#allocation4], 1 }

</bundles_post_ra>
